<compile_context>
chip_gen: v7x
topology: tpu7x:2x2x1
jax: 0.10.0
libtpu: 0.0.40
codegen_flags: <defaults>
</compile_context>

<pallas_src>
import functools

import jax
import jax.numpy as jnp
import numpy as np
from jax.experimental import pallas as pl
from jax.experimental.pallas import tpu as pltpu

# MXU operand dtype. bfloat16 is the native MXU format on all generations; the
# accumulation stays f32 via preferred_element_type. Use jnp.float32 for strict
# parity with the f32 reference (then the test passes at ~2e-3).
MXU_DTYPE = jnp.bfloat16

# 3x3 taps as (dy, dx) offsets, row-major -- matches w.reshape(9, Cin, Cout).
_TAPS = tuple((dy, dx) for dy in (-1, 0, 1) for dx in (-1, 0, 1))


def _elu(v):
    # exp() only on the non-positive branch -> no inf in the unselected lane.
    return jnp.where(v > 0.0, v, jnp.exp(jnp.minimum(v, 0.0)) - 1.0)


# ------------------------------ Pallas kernel ------------------------------

def _fused_conv_block_kernel(x_ref, m_ref, w1_ref, b1_ref, w2_ref, b2_ref,
                             g_ref, bt_ref, o_ref, *, h, w):
    """Whole ConvBlock forward for the full batch in one invocation.

    x_ref : (N, Cin, H*W)  f32   input, pixels on the lane axis
    m_ref : (9, N*H*W)     f32   per-tap 0/1 border-validity masks
    w1_ref: (Chid, 9*Cin)  bf16  conv1 weights, K = (tap, in-channel)
    b1_ref: (Chid, 1)      f32
    w2_ref: (Cout, 9*Chid) bf16  conv2 weights, K = (tap, hidden-channel)
    b2_ref: (Cout, 1)      f32
    g_ref : (Cout, 1)      f32   BatchNorm gamma
    bt_ref: (Cout, 1)      f32   BatchNorm beta
    o_ref : (N, Cout, H*W) f32   output (NCHW order once reshaped)
    """
    n, cin, m = x_ref.shape
    nm = n * m
    eps = 1e-5

    # Flatten the batch onto the lane axis (lane-aligned concat: m % 128 == 0).
    x = jnp.concatenate([x_ref[i] for i in range(n)], axis=1)        # (Cin, NM)

    # Per-tap border masks, loaded once and reused by both convs.
    masks = [m_ref[pl.ds(t, 1), :] for t in range(len(_TAPS))]       # 9 x (1, NM)

    def stack_taps(v):
        # v: (C, NM) f32. Tap (dy, dx): output pixel p reads v[:, p + dy*w + dx],
        # i.e. a lane roll by -(dy*w + dx); out-of-image reads (and the roll's
        # wrap-around across rows / images) are zeroed by the 0/1 mask.
        parts = []
        for t, (dy, dx) in enumerate(_TAPS):
            s = dy * w + dx
            vr = v if s == 0 else pltpu.roll(v, shift=(-s) % nm, axis=1)
            parts.append(vr * masks[t])
        return jnp.concatenate(parts, axis=0)                        # (9*C, NM)

    # conv1 (3x3, stride 1, pad 1): one MXU matmul, K = 9*Cin, f32 accumulation.
    xs = stack_taps(x).astype(MXU_DTYPE)
    h1 = _elu(jnp.dot(w1_ref[...], xs, preferred_element_type=jnp.float32)
              + b1_ref[...])                                         # (Chid, NM) f32

    # conv2 (3x3, stride 1, pad 1): one MXU matmul, K = 9*Chid.  The hidden
    # activation h1 never leaves VMEM/registers.
    hs = stack_taps(h1).astype(MXU_DTYPE)
    y = _elu(jnp.dot(w2_ref[...], hs, preferred_element_type=jnp.float32)
             + b2_ref[...])                                          # (Cout, NM) f32

    # BatchNorm2d, training-mode batch statistics (biased variance), two-pass
    # mean/var in f32 (more robust than E[x^2] - mean^2).
    inv_count = 1.0 / jnp.float32(nm)
    mean = jnp.sum(y, axis=1, keepdims=True) * inv_count             # (Cout, 1)
    var = jnp.sum(jnp.square(y - mean), axis=1, keepdims=True) * inv_count
    scale = g_ref[...] * jax.lax.rsqrt(var + eps)
    shift = bt_ref[...] - mean * scale
    yb = y * scale + shift                                           # (Cout, NM)

    # Un-flatten the batch: static, lane-aligned (multiple-of-128) slices.
    for i in range(n):
        o_ref[i] = yb[:, i * m:(i + 1) * m]


# ------------------------------ wrapper ------------------------------

def _build_tap_masks(n, h, w):
    """(9, N*H*W) f32 0/1 mask: validity of each 3x3 tap at each output pixel."""
    col = np.tile(np.arange(w), n * h)
    row = np.tile(np.repeat(np.arange(h), w), n)
    rows = []
    for dy, dx in _TAPS:
        valid = np.ones(n * h * w, dtype=bool)
        if dx == 1:
            valid &= col < (w - 1)
        elif dx == -1:
            valid &= col >= 1
        if dy == 1:
            valid &= row < (h - 1)
        elif dy == -1:
            valid &= row >= 1
        rows.append(valid)
    return jnp.asarray(np.stack(rows).astype(np.float32))


def conv_block_forward(x_nchw, params):
    """Pallas implementation of ConvBlock.forward. (N, Cin, H, W) -> (N, Cout, H, W)."""
    w1, b1, w2, b2, gamma, beta = params              # w*: (3, 3, Cin, Cout) HWIO
    n, cin, h, w = x_nchw.shape
    chid, cout = w1.shape[-1], w2.shape[-1]
    m = h * w                                         # m and n*m are multiples of 128 here

    # Layout glue: free reshapes / tiny casts only (no pads, no transposes of x).
    x_in = x_nchw.reshape(n, cin, m).astype(jnp.float32)
    # HWIO (3,3,Cin,Cout) -> (Cout, 9*Cin): rows = out channel, cols = (tap, in channel).
    w1m = jnp.transpose(w1.reshape(9, cin, chid), (2, 0, 1)).reshape(chid, 9 * cin).astype(MXU_DTYPE)
    w2m = jnp.transpose(w2.reshape(9, chid, cout), (2, 0, 1)).reshape(cout, 9 * chid).astype(MXU_DTYPE)
    b1r = b1.reshape(chid, 1).astype(jnp.float32)
    b2r = b2.reshape(cout, 1).astype(jnp.float32)
    gr = gamma.reshape(cout, 1).astype(jnp.float32)
    br = beta.reshape(cout, 1).astype(jnp.float32)
    masks = _build_tap_masks(n, h, w)

    cost = pl.CostEstimate(
        flops=2 * n * m * 9 * (cin * chid + chid * cout),
        transcendentals=n * m * (chid + cout),
        bytes_accessed=4 * (n * cin * m + 9 * n * m + n * cout * m)
        + 2 * 9 * (cin * chid + chid * cout) + 4 * (chid + 3 * cout))

    vmem = pltpu.MemorySpace.VMEM
    out_flat = pl.pallas_call(
        functools.partial(_fused_conv_block_kernel, h=h, w=w),
        out_shape=jax.ShapeDtypeStruct((n, cout, m), jnp.float32),
        in_specs=[pl.BlockSpec(memory_space=vmem)] * 8,
        out_specs=pl.BlockSpec(memory_space=vmem),
        compiler_params=pltpu.CompilerParams(vmem_limit_bytes=32 * 1024 * 1024),
        cost_estimate=cost,
    )(x_in, masks, w1m, b1r, w2m, b2r, gr, br)

    return out_flat.reshape(n, cout, h, w)            # already NCHW


# ------------------------------ pure-JAX reference ------------------------------

def reference_forward(x_nchw, params):
    w1, b1, w2, b2, gamma, beta = params

    def conv(x, w_hwio, b):
        w_oihw = jnp.transpose(w_hwio, (3, 2, 0, 1))
        y = jax.lax.conv_general_dilated(
            x, w_oihw, window_strides=(1, 1), padding=((1, 1), (1, 1)),
            dimension_numbers=("NCHW", "OIHW", "NCHW"))
        return y + b[None, :, None, None]

    h1 = _elu(conv(x_nchw, w1, b1))
    y = _elu(conv(h1, w2, b2))
    mean = jnp.mean(y, axis=(0, 2, 3), keepdims=True)
    var = jnp.mean((y - mean) ** 2, axis=(0, 2, 3), keepdims=True)
    yn = (y - mean) * jax.lax.rsqrt(var + 1e-5)
    return yn * gamma[None, :, None, None] + beta[None, :, None, None]


# ------------------------------ main ------------------------------

if __name__ == "__main__":
    N, Cin, Chid, Cout, H, W = 2, 4, 8, 4, 16, 16

    key = jax.random.PRNGKey(0)
    k1, k2, k3, k4, k5 = jax.random.split(key, 5)
    x = jax.random.normal(k1, (N, Cin, H, W), jnp.float32)
    # Deterministic synthetic parameters (shapes implied by nn.Conv2d / BatchNorm2d).
    w1 = jax.random.normal(k2, (3, 3, Cin, Chid), jnp.float32) * 0.1   # HWIO
    b1 = jax.random.normal(k3, (Chid,), jnp.float32) * 0.1
    w2 = jax.random.normal(k4, (3, 3, Chid, Cout), jnp.float32) * 0.1  # HWIO
    b2 = jax.random.normal(k5, (Cout,), jnp.float32) * 0.1
    gamma = jnp.ones((Cout,), jnp.float32)    # BatchNorm2d default weight
    beta = jnp.zeros((Cout,), jnp.float32)    # BatchNorm2d default bias
    params = (w1, b1, w2, b2, gamma, beta)

    out = jax.block_until_ready(jax.jit(conv_block_forward)(x, params))
    ref = jax.block_until_ready(reference_forward(x, params))

    assert out.shape == (N, Cout, H, W), out.shape
    err = float(jnp.max(jnp.abs(out - ref)))
    # bf16 MXU operands -> loosened tolerance; with MXU_DTYPE=jnp.float32 this
    # design matches the f32 reference at ~2e-3.
    assert jnp.allclose(out, ref, atol=5e-2, rtol=5e-2), f"max abs err {err}"
    print("KERNEL_OK")
</pallas_src>

<mosaic_0001>
module attributes {stable_mosaic.version = 11 : i64} {
  func.func @_fused_conv_block_kernel(%arg0: memref<2x4x256xf32, #tpu.memory_space<vmem>>, %arg1: memref<9x512xf32, #tpu.memory_space<vmem>>, %arg2: memref<8x36xbf16, #tpu.memory_space<vmem>>, %arg3: memref<8x1xf32, #tpu.memory_space<vmem>>, %arg4: memref<4x72xbf16, #tpu.memory_space<vmem>>, %arg5: memref<4x1xf32, #tpu.memory_space<vmem>>, %arg6: memref<4x1xf32, #tpu.memory_space<vmem>>, %arg7: memref<4x1xf32, #tpu.memory_space<vmem>>, %arg8: memref<2x4x256xf32, #tpu.memory_space<vmem>>) attributes {dimension_semantics = [], scalar_prefetch = 0 : i64, scratch_operands = 0 : i64, tpu.core_type = #tpu.core_type<tc>} {
    %c0 = arith.constant 0 : index
    %c0_0 = arith.constant 0 : index
    %c0_1 = arith.constant 0 : index
    %0 = vector.load %arg0[%c0, %c0_0, %c0_1] : memref<2x4x256xf32, #tpu.memory_space<vmem>>, vector<1x4x256xf32>
    %1 = vector.shape_cast %0 : vector<1x4x256xf32> to vector<4x256xf32>
    %c1 = arith.constant 1 : index
    %c0_2 = arith.constant 0 : index
    %c0_3 = arith.constant 0 : index
    %2 = vector.load %arg0[%c1, %c0_2, %c0_3] : memref<2x4x256xf32, #tpu.memory_space<vmem>>, vector<1x4x256xf32>
    %3 = vector.shape_cast %2 : vector<1x4x256xf32> to vector<4x256xf32>
    %4 = tpu.concatenate %1, %3 in 1 : vector<4x256xf32>, vector<4x256xf32> -> vector<4x512xf32>
    %c0_4 = arith.constant 0 : index
    %c0_5 = arith.constant 0 : index
    %5 = vector.load %arg1[%c0_4, %c0_5] : memref<9x512xf32, #tpu.memory_space<vmem>>, vector<1x512xf32>
    %c1_6 = arith.constant 1 : index
    %c0_7 = arith.constant 0 : index
    %6 = vector.load %arg1[%c1_6, %c0_7] : memref<9x512xf32, #tpu.memory_space<vmem>>, vector<1x512xf32>
    %c2 = arith.constant 2 : index
    %c0_8 = arith.constant 0 : index
    %7 = vector.load %arg1[%c2, %c0_8] : memref<9x512xf32, #tpu.memory_space<vmem>>, vector<1x512xf32>
    %c3 = arith.constant 3 : index
    %c0_9 = arith.constant 0 : index
    %8 = vector.load %arg1[%c3, %c0_9] : memref<9x512xf32, #tpu.memory_space<vmem>>, vector<1x512xf32>
    %c4 = arith.constant 4 : index
    %c0_10 = arith.constant 0 : index
    %9 = vector.load %arg1[%c4, %c0_10] : memref<9x512xf32, #tpu.memory_space<vmem>>, vector<1x512xf32>
    %c5 = arith.constant 5 : index
    %c0_11 = arith.constant 0 : index
    %10 = vector.load %arg1[%c5, %c0_11] : memref<9x512xf32, #tpu.memory_space<vmem>>, vector<1x512xf32>
    %c6 = arith.constant 6 : index
    %c0_12 = arith.constant 0 : index
    %11 = vector.load %arg1[%c6, %c0_12] : memref<9x512xf32, #tpu.memory_space<vmem>>, vector<1x512xf32>
    %c7 = arith.constant 7 : index
    %c0_13 = arith.constant 0 : index
    %12 = vector.load %arg1[%c7, %c0_13] : memref<9x512xf32, #tpu.memory_space<vmem>>, vector<1x512xf32>
    %c8 = arith.constant 8 : index
    %c0_14 = arith.constant 0 : index
    %13 = vector.load %arg1[%c8, %c0_14] : memref<9x512xf32, #tpu.memory_space<vmem>>, vector<1x512xf32>
    %c17_i32 = arith.constant 17 : i32
    %14 = tpu.dynamic_rotate %4 by %c17_i32 dim 1 : vector<4x512xf32>, i32 -> vector<4x512xf32>
    %15 = vector.broadcast %5 : vector<1x512xf32> to vector<4x512xf32>
    %16 = arith.mulf %14, %15 : vector<4x512xf32>
    %c16_i32 = arith.constant 16 : i32
    %17 = tpu.dynamic_rotate %4 by %c16_i32 dim 1 : vector<4x512xf32>, i32 -> vector<4x512xf32>
    %18 = vector.broadcast %6 : vector<1x512xf32> to vector<4x512xf32>
    %19 = arith.mulf %17, %18 : vector<4x512xf32>
    %c15_i32 = arith.constant 15 : i32
    %20 = tpu.dynamic_rotate %4 by %c15_i32 dim 1 : vector<4x512xf32>, i32 -> vector<4x512xf32>
    %21 = vector.broadcast %7 : vector<1x512xf32> to vector<4x512xf32>
    %22 = arith.mulf %20, %21 : vector<4x512xf32>
    %c1_i32 = arith.constant 1 : i32
    %23 = tpu.dynamic_rotate %4 by %c1_i32 dim 1 : vector<4x512xf32>, i32 -> vector<4x512xf32>
    %24 = vector.broadcast %8 : vector<1x512xf32> to vector<4x512xf32>
    %25 = arith.mulf %23, %24 : vector<4x512xf32>
    %26 = vector.broadcast %9 : vector<1x512xf32> to vector<4x512xf32>
    %27 = arith.mulf %4, %26 : vector<4x512xf32>
    %c511_i32 = arith.constant 511 : i32
    %28 = tpu.dynamic_rotate %4 by %c511_i32 dim 1 : vector<4x512xf32>, i32 -> vector<4x512xf32>
    %29 = vector.broadcast %10 : vector<1x512xf32> to vector<4x512xf32>
    %30 = arith.mulf %28, %29 : vector<4x512xf32>
    %c497_i32 = arith.constant 497 : i32
    %31 = tpu.dynamic_rotate %4 by %c497_i32 dim 1 : vector<4x512xf32>, i32 -> vector<4x512xf32>
    %32 = vector.broadcast %11 : vector<1x512xf32> to vector<4x512xf32>
    %33 = arith.mulf %31, %32 : vector<4x512xf32>
    %c496_i32 = arith.constant 496 : i32
    %34 = tpu.dynamic_rotate %4 by %c496_i32 dim 1 : vector<4x512xf32>, i32 -> vector<4x512xf32>
    %35 = vector.broadcast %12 : vector<1x512xf32> to vector<4x512xf32>
    %36 = arith.mulf %34, %35 : vector<4x512xf32>
    %c495_i32 = arith.constant 495 : i32
    %37 = tpu.dynamic_rotate %4 by %c495_i32 dim 1 : vector<4x512xf32>, i32 -> vector<4x512xf32>
    %38 = vector.broadcast %13 : vector<1x512xf32> to vector<4x512xf32>
    %39 = arith.mulf %37, %38 : vector<4x512xf32>
    %40 = tpu.concatenate %16, %19, %22, %25, %27, %30, %33, %36, %39 in 0 : vector<4x512xf32>, vector<4x512xf32>, vector<4x512xf32>, vector<4x512xf32>, vector<4x512xf32>, vector<4x512xf32>, vector<4x512xf32>, vector<4x512xf32>, vector<4x512xf32> -> vector<36x512xf32>
    %41 = arith.truncf %40 : vector<36x512xf32> to vector<36x512xbf16>
    %c0_15 = arith.constant 0 : index
    %c0_16 = arith.constant 0 : index
    %42 = vector.load %arg2[%c0_15, %c0_16] : memref<8x36xbf16, #tpu.memory_space<vmem>>, vector<8x36xbf16>
    %cst = arith.constant dense<0.000000e+00> : vector<8x512xf32>
    %43 = tpu.matmul %42, %41, %cst {dimension_numbers = #tpu.dot_dimension_numbers<[1], [0], [0], [1], [0, 0, 1, 1], [], []>} : vector<8x36xbf16>, vector<36x512xbf16>, vector<8x512xf32> -> vector<8x512xf32>
    %c0_17 = arith.constant 0 : index
    %c0_18 = arith.constant 0 : index
    %44 = vector.load %arg3[%c0_17, %c0_18] : memref<8x1xf32, #tpu.memory_space<vmem>>, vector<8x1xf32>
    %45 = vector.broadcast %44 : vector<8x1xf32> to vector<8x512xf32>
    %46 = arith.addf %43, %45 : vector<8x512xf32>
    %cst_19 = arith.constant 0.000000e+00 : f32
    %47 = vector.broadcast %cst_19 : f32 to vector<8x512xf32>
    %48 = arith.cmpf ogt, %46, %47 : vector<8x512xf32>
    %cst_20 = arith.constant 0.000000e+00 : f32
    %49 = vector.broadcast %cst_20 : f32 to vector<8x512xf32>
    %50 = arith.minimumf %46, %49 : vector<8x512xf32>
    %51 = math.exp %50 : vector<8x512xf32>
    %cst_21 = arith.constant 1.000000e+00 : f32
    %52 = vector.broadcast %cst_21 : f32 to vector<8x512xf32>
    %53 = arith.subf %51, %52 : vector<8x512xf32>
    %54 = arith.select %48, %46, %53 : vector<8x512xi1>, vector<8x512xf32>
    %c17_i32_22 = arith.constant 17 : i32
    %55 = tpu.dynamic_rotate %54 by %c17_i32_22 dim 1 : vector<8x512xf32>, i32 -> vector<8x512xf32>
    %56 = vector.broadcast %5 : vector<1x512xf32> to vector<8x512xf32>
    %57 = arith.mulf %55, %56 : vector<8x512xf32>
    %c16_i32_23 = arith.constant 16 : i32
    %58 = tpu.dynamic_rotate %54 by %c16_i32_23 dim 1 : vector<8x512xf32>, i32 -> vector<8x512xf32>
    %59 = vector.broadcast %6 : vector<1x512xf32> to vector<8x512xf32>
    %60 = arith.mulf %58, %59 : vector<8x512xf32>
    %c15_i32_24 = arith.constant 15 : i32
    %61 = tpu.dynamic_rotate %54 by %c15_i32_24 dim 1 : vector<8x512xf32>, i32 -> vector<8x512xf32>
    %62 = vector.broadcast %7 : vector<1x512xf32> to vector<8x512xf32>
    %63 = arith.mulf %61, %62 : vector<8x512xf32>
    %c1_i32_25 = arith.constant 1 : i32
    %64 = tpu.dynamic_rotate %54 by %c1_i32_25 dim 1 : vector<8x512xf32>, i32 -> vector<8x512xf32>
    %65 = vector.broadcast %8 : vector<1x512xf32> to vector<8x512xf32>
    %66 = arith.mulf %64, %65 : vector<8x512xf32>
    %67 = vector.broadcast %9 : vector<1x512xf32> to vector<8x512xf32>
    %68 = arith.mulf %54, %67 : vector<8x512xf32>
    %c511_i32_26 = arith.constant 511 : i32
    %69 = tpu.dynamic_rotate %54 by %c511_i32_26 dim 1 : vector<8x512xf32>, i32 -> vector<8x512xf32>
    %70 = vector.broadcast %10 : vector<1x512xf32> to vector<8x512xf32>
    %71 = arith.mulf %69, %70 : vector<8x512xf32>
    %c497_i32_27 = arith.constant 497 : i32
    %72 = tpu.dynamic_rotate %54 by %c497_i32_27 dim 1 : vector<8x512xf32>, i32 -> vector<8x512xf32>
    %73 = vector.broadcast %11 : vector<1x512xf32> to vector<8x512xf32>
    %74 = arith.mulf %72, %73 : vector<8x512xf32>
    %c496_i32_28 = arith.constant 496 : i32
    %75 = tpu.dynamic_rotate %54 by %c496_i32_28 dim 1 : vector<8x512xf32>, i32 -> vector<8x512xf32>
    %76 = vector.broadcast %12 : vector<1x512xf32> to vector<8x512xf32>
    %77 = arith.mulf %75, %76 : vector<8x512xf32>
    %c495_i32_29 = arith.constant 495 : i32
    %78 = tpu.dynamic_rotate %54 by %c495_i32_29 dim 1 : vector<8x512xf32>, i32 -> vector<8x512xf32>
    %79 = vector.broadcast %13 : vector<1x512xf32> to vector<8x512xf32>
    %80 = arith.mulf %78, %79 : vector<8x512xf32>
    %81 = tpu.concatenate %57, %60, %63, %66, %68, %71, %74, %77, %80 in 0 : vector<8x512xf32>, vector<8x512xf32>, vector<8x512xf32>, vector<8x512xf32>, vector<8x512xf32>, vector<8x512xf32>, vector<8x512xf32>, vector<8x512xf32>, vector<8x512xf32> -> vector<72x512xf32>
    %82 = arith.truncf %81 : vector<72x512xf32> to vector<72x512xbf16>
    %c0_30 = arith.constant 0 : index
    %c0_31 = arith.constant 0 : index
    %83 = vector.load %arg4[%c0_30, %c0_31] : memref<4x72xbf16, #tpu.memory_space<vmem>>, vector<4x72xbf16>
    %cst_32 = arith.constant dense<0.000000e+00> : vector<4x512xf32>
    %84 = tpu.matmul %83, %82, %cst_32 {dimension_numbers = #tpu.dot_dimension_numbers<[1], [0], [0], [1], [0, 0, 1, 1], [], []>} : vector<4x72xbf16>, vector<72x512xbf16>, vector<4x512xf32> -> vector<4x512xf32>
    %c0_33 = arith.constant 0 : index
    %c0_34 = arith.constant 0 : index
    %85 = vector.load %arg5[%c0_33, %c0_34] : memref<4x1xf32, #tpu.memory_space<vmem>>, vector<4x1xf32>
    %86 = vector.broadcast %85 : vector<4x1xf32> to vector<4x512xf32>
    %87 = arith.addf %84, %86 : vector<4x512xf32>
    %cst_35 = arith.constant 0.000000e+00 : f32
    %88 = vector.broadcast %cst_35 : f32 to vector<4x512xf32>
    %89 = arith.cmpf ogt, %87, %88 : vector<4x512xf32>
    %cst_36 = arith.constant 0.000000e+00 : f32
    %90 = vector.broadcast %cst_36 : f32 to vector<4x512xf32>
    %91 = arith.minimumf %87, %90 : vector<4x512xf32>
    %92 = math.exp %91 : vector<4x512xf32>
    %cst_37 = arith.constant 1.000000e+00 : f32
    %93 = vector.broadcast %cst_37 : f32 to vector<4x512xf32>
    %94 = arith.subf %92, %93 : vector<4x512xf32>
    %95 = arith.select %89, %87, %94 : vector<4x512xi1>, vector<4x512xf32>
    %cst_38 = arith.constant 1.000000e+00 : f32
    %cst_39 = arith.constant 5.120000e+02 : f32
    %96 = arith.divf %cst_38, %cst_39 : f32
    %cst_40 = arith.constant dense<0.000000e+00> : vector<4xf32>
    %97 = vector.multi_reduction <add>, %95, %cst_40 [1] : vector<4x512xf32> to vector<4xf32>
    %98 = vector.shape_cast %97 : vector<4xf32> to vector<4x1xf32>
    %99 = vector.broadcast %96 : f32 to vector<4x1xf32>
    %100 = arith.mulf %98, %99 : vector<4x1xf32>
    %101 = vector.broadcast %100 : vector<4x1xf32> to vector<4x512xf32>
    %102 = arith.subf %95, %101 : vector<4x512xf32>
    %103 = arith.mulf %102, %102 : vector<4x512xf32>
    %cst_41 = arith.constant dense<0.000000e+00> : vector<4xf32>
    %104 = vector.multi_reduction <add>, %103, %cst_41 [1] : vector<4x512xf32> to vector<4xf32>
    %105 = vector.shape_cast %104 : vector<4xf32> to vector<4x1xf32>
    %106 = vector.broadcast %96 : f32 to vector<4x1xf32>
    %107 = arith.mulf %105, %106 : vector<4x1xf32>
    %c0_42 = arith.constant 0 : index
    %c0_43 = arith.constant 0 : index
    %108 = vector.load %arg6[%c0_42, %c0_43] : memref<4x1xf32, #tpu.memory_space<vmem>>, vector<4x1xf32>
    %cst_44 = arith.constant 9.99999974E-6 : f32
    %109 = vector.broadcast %cst_44 : f32 to vector<4x1xf32>
    %110 = arith.addf %107, %109 : vector<4x1xf32>
    %111 = math.rsqrt %110 : vector<4x1xf32>
    %112 = arith.mulf %108, %111 : vector<4x1xf32>
    %c0_45 = arith.constant 0 : index
    %c0_46 = arith.constant 0 : index
    %113 = vector.load %arg7[%c0_45, %c0_46] : memref<4x1xf32, #tpu.memory_space<vmem>>, vector<4x1xf32>
    %114 = arith.mulf %100, %112 : vector<4x1xf32>
    %115 = arith.subf %113, %114 : vector<4x1xf32>
    %116 = vector.broadcast %112 : vector<4x1xf32> to vector<4x512xf32>
    %117 = arith.mulf %95, %116 : vector<4x512xf32>
    %118 = vector.broadcast %115 : vector<4x1xf32> to vector<4x512xf32>
    %119 = arith.addf %117, %118 : vector<4x512xf32>
    %120 = vector.extract_strided_slice %119 {offsets = [0, 0], sizes = [4, 256], strides = [1, 1]} : vector<4x512xf32> to vector<4x256xf32>
    %c0_47 = arith.constant 0 : index
    %c0_48 = arith.constant 0 : index
    %c0_49 = arith.constant 0 : index
    %121 = vector.load %arg8[%c0_47, %c0_48, %c0_49] : memref<2x4x256xf32, #tpu.memory_space<vmem>>, vector<1x4x256xf32>
    %122 = vector.shape_cast %121 : vector<1x4x256xf32> to vector<4x256xf32>
    %123 = vector.shape_cast %120 : vector<4x256xf32> to vector<1x4x256xf32>
    tpu.vector_store %arg8[%c0_47, %c0_48, %c0_49], %123 {strides = array<i32>} : memref<2x4x256xf32, #tpu.memory_space<vmem>>, vector<1x4x256xf32>,
    %124 = vector.extract_strided_slice %119 {offsets = [0, 256], sizes = [4, 256], strides = [1, 1]} : vector<4x512xf32> to vector<4x256xf32>
    %c1_50 = arith.constant 1 : index
    %c0_51 = arith.constant 0 : index
    %c0_52 = arith.constant 0 : index
    %125 = vector.load %arg8[%c1_50, %c0_51, %c0_52] : memref<2x4x256xf32, #tpu.memory_space<vmem>>, vector<1x4x256xf32>
    %126 = vector.shape_cast %125 : vector<1x4x256xf32> to vector<4x256xf32>
    %127 = vector.shape_cast %124 : vector<4x256xf32> to vector<1x4x256xf32>
    tpu.vector_store %arg8[%c1_50, %c0_51, %c0_52], %127 {strides = array<i32>} : memref<2x4x256xf32, #tpu.memory_space<vmem>>, vector<1x4x256xf32>,
    return
  }
}

</mosaic_0001>

<bundles_post_ra>
// kernel: conv_block_forward.1
= control target key start
LH: loop header
LB: loop body
LE: loop exit
PB: predicated region body
PF: predicated region fallthrough
CT: control target
= control target key end

     0   :  { %s1000_s29 = smov 1   ;;  %s1001_s30 = smov 16   ;;  %v1672_v4 = vmov 0   ;;  %v64_v8 = vlaneseq  ;;  %vm435_vm4 = vcmask 1043456   ;;  %vm475_vm9 = vcmask 1041408   ;;  %s1663_s0 = inlined_call_operand.vmem [shape: f32[2,4,256], index: 0, kind: input, shape index: {}]   ;;  %s1664_s3 = inlined_call_operand.vmem [shape: f32[8,1], index: 3, kind: input, shape index: {}]   ;;  %s1665_s1 = inlined_call_operand.vmem [shape: f32[9,512], index: 1, kind: input, shape index: {}]   ;;  %s1666_s2 = inlined_call_operand.vmem [shape: bf16[8,36], index: 2, kind: input, shape index: {}]   ;;  %s1667_s5 = inlined_call_operand.vmem [shape: f32[4,1], index: 5, kind: input, shape index: {}]   ;;  %s1668_s4 = inlined_call_operand.vmem [shape: bf16[4,72], index: 4, kind: input, shape index: {}]   ;;  %s1669_s6 = inlined_call_operand.vmem [shape: f32[4,1], index: 6, kind: input, shape index: {}]   ;;  %s1670_s7 = inlined_call_operand.vmem [shape: f32[4,1], index: 7, kind: input, shape index: {}]   ;;  %s1671_s8 = inlined_call_operand.vmem [shape: f32[2,4,256], index: 8, kind: output, shape index: {}]  }
   0x1   :  { %v1057_v0 = vld [vmem:[%s1663_s0] sm:$0xff]  ;;  %v1070_v2 = vld [vmem:[%s1663_s0 + $0x8] sm:$0xff]  ;;  %s1002_s0 = smov 17   ;;  %s1003_s11 = smov 15   ;;  %520 = vmatprep.mubr.bf16.mxu0 %v1672_v4  ;;  %561 = vmatprep.mubr.bf16.mxu1 %v1672_v4  ;;  %vm471_vm10 = vcmask 293888   ;;  %vm753_vm15 = vcmask 588800  }
   0x2   :  { %172 = vrot.lane.b32.xlu1 %v1057_v0, %s1000_s29  ;;  %96 = vrot.lane.b32.xlu0 %v1057_v0, %s1001_s30  ;;  %v1065_v1 = vcombine.high %v1057_v0, %v1057_v0  ;;  %v1078_v3 = vcombine.high %v1070_v2, %v1070_v2  ;;  %s1004_s12 = smov 127   ;;  %s1005_s13 = smov 112   ;;  %v465_v5 = vld [vmem:[%s1664_s3] sm:$0xff]  ;;  %v73_v11 = vshrl.u32 %v64_v8, 7  ;;  %v1143_v12 = vand.u32 127, %v64_v8 }
   0x3   :  { %s1006_s14 = smov 113   ;;  %978 = vset.pattern.permute.xlu0 %v1672_v4  ;;  %979 = vset.pattern.permute.xlu1 %v1672_v4  ;;  %s1008_s15 = smov 111   ;;  %v946_v16 = vld [vmem:[%s1665_s1 + $0x3] ss:$8 sm:$0xf] }
   0x4   :  { %v1145_v15 = vsub.s32 1, %v73_v11  ;;  %v944_v17 = vld [vmem:[%s1665_s1 + $0x1] ss:$8 sm:$0xf]  ;;  %vm180_vm0 = vcmp.lt.s32.totalorder %v1143_v12, 1  ;;  %vm104_vm1 = vcmp.lt.s32.totalorder %v1143_v12, 16 }
   0x5   :  { %v1155_v18 = vsub.s32 0, %v73_v11  ;;  %v1157_v21 = vsub.s32 2, %v73_v11  ;;  %v1159_v22 = vsub.s32 3, %v73_v11  ;;  %v39_v23 = vld [vmem:[%s1665_s1] ss:$8 sm:$0xf] }
   0x6   :  { %174 = vrot.lane.b32.xlu1 %v1065_v1, %s1000_s29  ;;  %98 = vrot.lane.b32.xlu0 %v1065_v1, %s1001_s30  ;;  %v1165_v24 = vrot.slane %v946_v16, %v1145_v15  ;;  %v1168_v25 = vrot.slane %v944_v17, %v1145_v15  ;;  %vm66_vm2 = vcmp.lt.s32.totalorder %v1143_v12, 17  ;;  %v945_v28 = vld [vmem:[%s1665_s1 + $0x2] ss:$8 sm:$0xf]  ;;  %v1182_v31 = vrot.slane %v39_v23, %v1145_v15 }
   0x7   :  { %v1179_v29 = vrot.slane %v944_v17, %v1155_v18  ;;  %v1185_v33 = vrot.slane %v944_v17, %v1157_v21  ;;  %v1188_v34 = vrot.slane %v944_v17, %v1159_v22  ;;  %v1191_v35 = vrot.slane %v946_v16, %v1155_v18 }
   0x8   :  { %vm142_vm3 = vcmp.lt.s32.totalorder %v1143_v12, 15  ;;  %v1199_v39 = vrot.slane %v945_v28, %v1145_v15  ;;  %v1202_v40 = vrot.slane %v946_v16, %v1157_v21  ;;  %v1205_v41 = vrot.slane %v946_v16, %v1159_v22 }
   0x9   :  { %v1208_v42 = vrot.slane %v39_v23, %v1155_v18  ;;  %v1224_v52 = vrot.slane %v39_v23, %v1157_v21  ;;  %v1228_v56 = vrot.slane %v39_v23, %v1159_v22  ;;  %v1250_v16 = vrot.slane %v945_v28, %v1157_v21 }
   0xa   :  { %102 = vrot.lane.b32.xlu1 %v1078_v3, %s1001_s30  ;;  %100 = vrot.lane.b32.xlu0 %v1070_v2, %s1001_s30  ;;  %v1253_v17 = vrot.slane %v945_v28, %v1159_v22  ;;  %vm243_vm5 = vcmp.lt.s32.totalorder %v1143_v12, 127  ;;  %vm319_vm6 = vcmp.lt.s32.totalorder %v1143_v12, 112  ;;  %vm281_vm7 = vcmp.lt.s32.totalorder %v1143_v12, 113 }
   0xb   :  { %vm357_vm8 = vcmp.lt.s32.totalorder %v1143_v12, 111 }
   0xe   :  { %178 = vrot.lane.b32.xlu1 %v1078_v3, %s1000_s29  ;;  %176 = vrot.lane.b32.xlu0 %v1070_v2, %s1000_s29 }
  0x12   :  { %58 = vrot.lane.b32.xlu1 %v1065_v1, %s1002_s0  ;;  %56 = vrot.lane.b32.xlu0 %v1057_v0, %s1002_s0 }
  0x16   :  { %136 = vrot.lane.b32.xlu1 %v1065_v1, %s1003_s11  ;;  %134 = vrot.lane.b32.xlu0 %v1057_v0, %s1003_s11 }
  0x1a   :  { %62 = vrot.lane.b32.xlu1 %v1078_v3, %s1002_s0  ;;  %60 = vrot.lane.b32.xlu0 %v1070_v2, %s1002_s0 }
  0x1e   :  { %140 = vrot.lane.b32.xlu1 %v1078_v3, %s1003_s11  ;;  %138 = vrot.lane.b32.xlu0 %v1070_v2, %s1003_s11 }
  0x22   :  { %239 = vrot.lane.b32.xlu1 %v1070_v2, %s1004_s12  ;;  %237 = vrot.lane.b32.xlu0 %v1065_v1, %s1004_s12 }
  0x26   :  { %315 = vrot.lane.b32.xlu1 %v1070_v2, %s1005_s13  ;;  %313 = vrot.lane.b32.xlu0 %v1065_v1, %s1005_s13 }
  0x2a   :  { %241 = vrot.lane.b32.xlu1 %v1078_v3, %s1004_s12  ;;  %235 = vrot.lane.b32.xlu0 %v1057_v0, %s1004_s12 }
  0x2e   :  { %317 = vrot.lane.b32.xlu1 %v1078_v3, %s1005_s13  ;;  %311 = vrot.lane.b32.xlu0 %v1057_v0, %s1005_s13 }
  0x32   :  { %277 = vrot.lane.b32.xlu1 %v1070_v2, %s1006_s14  ;;  %275 = vrot.lane.b32.xlu0 %v1065_v1, %s1006_s14 }
  0x36   :  { %279 = vrot.lane.b32.xlu1 %v1078_v3, %s1006_s14  ;;  %273 = vrot.lane.b32.xlu0 %v1057_v0, %s1006_s14 }
  0x3a   :  { %351 = vrot.lane.b32.xlu1 %v1065_v1, %s1008_s15  ;;  %349 = vrot.lane.b32.xlu0 %v1057_v0, %s1008_s15 }
  0x3e   :  { %355 = vrot.lane.b32.xlu1 %v1078_v3, %s1008_s15  ;;  %353 = vrot.lane.b32.xlu0 %v1070_v2, %s1008_s15 }
  0x42   :  { %468 = vperm.xlu0 %978, %v465_v5  }
  0x74   :  { %v173_v6 = vpop.permute.xlu1 %172  ;;  %v97_v7 = vpop.permute.xlu0 %96 }
  0x78   :  { %v175_v9 = vpop.permute.xlu1 %174  ;;  %v99_v10 = vpop.permute.xlu0 %98 }
  0x79   :  { %v183_v26 = vsel %vm180_vm0, %v173_v6, %v175_v9  ;;  %v107_v27 = vsel %vm104_vm1, %v97_v7, %v99_v10 }
  0x7a   :  { %v207_v37 = vmul.f32 %v1165_v24, %v183_v26  ;;  %v131_v38 = vmul.f32 %v1168_v25, %v107_v27 }
  0x7c   :  { %v103_v13 = vpop.permute.xlu1 %102  ;;  %v101_v14 = vpop.permute.xlu0 %100  ;;  %v404_v53 = vrot.slane %v207_v37, 4  ;;  %v392_v54 = vrot.slane %v131_v38, 4 }
  0x7d   :  { %v108_v43 = vsel %vm104_vm1, %v103_v13, %v97_v7  ;;  %v105_v44 = vsel %vm104_vm1, %v101_v14, %v103_v13  ;;  %v106_v45 = vsel %vm104_vm1, %v99_v10, %v101_v14  ;;  %v1247_v14 = vrot.slane %v945_v28, %v1155_v18 }
  0x7e   :  { %v130_v57 = vmul.f32 %v1179_v29, %v108_v43  ;;  %v132_v58 = vmul.f32 %v1185_v33, %v106_v45  ;;  %v133_v59 = vmul.f32 %v1188_v34, %v105_v44 }
  0x80   :  { %v179_v19 = vpop.permute.xlu1 %178  ;;  %v177_v20 = vpop.permute.xlu0 %176  ;;  %v393_v26 = vrot.slane %v132_v58, 4  ;;  %v394_v27 = vrot.slane %v133_v59, 4 }
  0x81   :  { %v184_v49 = vsel %vm180_vm0, %v179_v19, %v173_v6  ;;  %v182_v50 = vsel %vm180_vm0, %v175_v9, %v177_v20  ;;  %v181_v60 = vsel %vm180_vm0, %v177_v20, %v179_v19  ;;  %v391_v19 = vrot.slane %v130_v57, 4 }
  0x82   :  { %v206_v61 = vmul.f32 %v1191_v35, %v184_v49  ;;  %v208_v62 = vmul.f32 %v1202_v40, %v182_v50  ;;  %v209_v13 = vmul.f32 %v1205_v41, %v181_v60 }
  0x84   :  { %v59_v30 = vpop.permute.xlu1 %58  ;;  %v57_v32 = vpop.permute.xlu0 %56  ;;  %v405_v38 = vrot.slane %v208_v62, 4  ;;  %v406_v45 = vrot.slane %v209_v13, 4  ;;  %v947_v62 = vld [vmem:[%s1665_s1 + $0x4] ss:$8 sm:$0xf] }
  0x85   :  { %v69_v36 = vsel %vm66_vm2, %v57_v32, %v59_v30 }
  0x86   :  { %v93_v46 = vmul.f32 %v1182_v31, %v69_v36 }
  0x88   :  { %v137_v47 = vpop.permute.xlu1 %136  ;;  %v135_v48 = vpop.permute.xlu0 %134  ;;  %v437_v6 = vsel %vm435_vm4, %v93_v46, %v392_v54 }
  0x89   :  { %v145_v51 = vsel %vm142_vm3, %v135_v48, %v137_v47 }
  0x8a   :  { %v169_v55 = vmul.f32 %v1199_v39, %v145_v51 }
  0x8c   :  { %v63_v63 = vpop.permute.xlu1 %62  ;;  %v61_v5 = vpop.permute.xlu0 %60  ;;  %v441_v7 = vsel %vm435_vm4, %v169_v55, %v404_v53 }
  0x8d   :  { %v70_v8 = vsel %vm66_vm2, %v63_v63, %v57_v32  ;;  %v67_v9 = vsel %vm66_vm2, %v61_v5, %v63_v63  ;;  %v68_v10 = vsel %vm66_vm2, %v59_v30, %v61_v5  ;;  %v453_v11 = vpack.c.bf16 %v441_v7, %v437_v6  ;;  %v948_v63 = vld [vmem:[%s1665_s1 + $0x5] ss:$8 sm:$0xf] }
  0x8e   :  { %v92_v20 = vmul.f32 %v1208_v42, %v70_v8  ;;  %v95_v23 = vmul.f32 %v1228_v56, %v67_v9  ;;  %v403_v30 = vrot.slane %v206_v61, 4  ;;  %v94_v32 = vmul.f32 %v1224_v52, %v68_v10  ;;  %v950_v8 = vld [vmem:[%s1665_s1 + $0x7] ss:$8 sm:$0xf] }
  0x8f   :  { %488 = vmatprep.subr.bf16.mxu0 %v453_v11  ;;  %v1281_v7 = vrot.slane %v947_v62, %v1145_v15  ;;  %v1287_v9 = vrot.slane %v948_v63, %v1145_v15 }
  0x90   :  { %v141_v36 = vpop.permute.xlu1 %140  ;;  %v139_v37 = vpop.permute.xlu0 %138  ;;  %v436_v51 = vsel %vm435_vm4, %v92_v20, %v391_v19  ;;  %v439_v53 = vsel %vm435_vm4, %v95_v23, %v394_v27  ;;  %v438_v58 = vsel %vm435_vm4, %v94_v32, %v393_v26  ;;  %v1293_v19 = vrot.slane %v950_v8, %v1145_v15 }
  0x91   :  { %v146_v43 = vsel %vm142_vm3, %v141_v36, %v135_v48  ;;  %v143_v28 = vsel %vm142_vm3, %v139_v37, %v141_v36  ;;  %v144_v44 = vsel %vm142_vm3, %v137_v47, %v139_v37  ;;  %v232_v20 = vmul.f32 %v1281_v7, %v1065_v1 }
  0x92   :  { %v168_v46 = vmul.f32 %v1247_v14, %v146_v43  ;;  %v170_v49 = vmul.f32 %v1250_v16, %v144_v44  ;;  %v171_v50 = vmul.f32 %v1253_v17, %v143_v28  ;;  %v1298_v23 = vrot.slane %v947_v62, %v1155_v18 }
  0x93   :  { %v1301_v26 = vrot.slane %v948_v63, %v1157_v21  ;;  %v1304_v27 = vrot.slane %v948_v63, %v1155_v18  ;;  %v1310_v32 = vrot.slane %v947_v62, %v1159_v22  ;;  %v1316_v37 = vrot.slane %v950_v8, %v1157_v21 }
  0x94   :  { %v240_v54 = vpop.permute.xlu1 %239  ;;  %v238_v55 = vpop.permute.xlu0 %237  ;;  %v440_v48 = vsel %vm435_vm4, %v168_v46, %v403_v30  ;;  %v443_v57 = vsel %vm435_vm4, %v171_v50, %v406_v45  ;;  %v442_v47 = vsel %vm435_vm4, %v170_v49, %v405_v38  ;;  %v1307_v30 = vrot.slane %v948_v63, %v1159_v22  ;;  %v949_v38 = vld [vmem:[%s1665_s1 + $0x6] ss:$8 sm:$0xf] }
  0x95   :  { %v452_v59 = vpack.c.bf16 %v440_v48, %v436_v51  ;;  %v455_v60 = vpack.c.bf16 %v443_v57, %v439_v53  ;;  %v454_v61 = vpack.c.bf16 %v442_v47, %v438_v58  ;;  %v245_v10 = vsel %vm243_vm5, %v238_v55, %v240_v54  ;;  %1681 = vst [vmem:[#allocation2_spill] sm:$0xff] %v1316_v37 }
  0x96   :  { %v270_v36 = vmul.f32 %v1287_v9, %v245_v10  ;;  %v1322_v43 = vrot.slane %v947_v62, %v1157_v21  ;;  %v1329_v46 = vrot.slane %v950_v8, %v1155_v18  ;;  %v1332_v49 = vrot.slane %v950_v8, %v1159_v22 }
  0x97   :  { %489 = vmatpush1.bf16.msra.mxu0 %v452_v59  ;;  %529 = vmatprep.subr.bf16.mxu1 %v455_v60  ;;  %v231_v48 = vmul.f32 %v1298_v23, %v1057_v0  ;;  %v1345_v58 = vrot.slane %v949_v38, %v1145_v15  ;;  %v234_v47 = vmul.f32 %v1310_v32, %v1078_v3  ;;  %v951_v3 = vld [vmem:[%s1665_s1 + $0x20] ss:$8 sm:$0xf] }
  0x98   :  { %v316_v5 = vpop.permute.xlu1 %315  ;;  %530 = vmatpush1.bf16.msra.mxu1 %v454_v61  ;;  %v314_v6 = vpop.permute.xlu0 %313  ;;  %1682 = vst [vmem:[#allocation3_spill] sm:$0xff] %v1332_v49  ;;  %v233_v8 = vmul.f32 %v1070_v2, %v1322_v43 }
  0x99   :  { %v321_v1 = vsel %vm319_vm6, %v314_v6, %v316_v5 }
  0x9a   :  { %v346_v57 = vmul.f32 %v1293_v19, %v321_v1 }
  0x9c   :  { %v242_v11 = vpop.permute.xlu1 %241  ;;  %v236_v13 = vpop.permute.xlu0 %235  ;;  %v428_v1 = vrot.slane %v346_v57, 4 }
  0x9d   :  { %v246_v28 = vsel %vm243_vm5, %v236_v13, %v238_v55  ;;  %v247_v44 = vsel %vm243_vm5, %v242_v11, %v236_v13  ;;  %v244_v51 = vsel %vm243_vm5, %v240_v54, %v242_v11  ;;  %v416_v54 = vrot.slane %v270_v36, 4 }
  0x9e   :  { %v269_v59 = vmul.f32 %v1304_v27, %v246_v28  ;;  %v272_v60 = vmul.f32 %v1307_v30, %v247_v44  ;;  %v271_v0 = vmul.f32 %v1301_v26, %v244_v51  ;;  %v1364_v11 = vrot.slane %v949_v38, %v1157_v21 }
  0x9f   :  { %v1367_v13 = vrot.slane %v949_v38, %v1155_v18  ;;  %v1370_v36 = vrot.slane %v949_v38, %v1159_v22  ;;  %v1377_v51 = vrot.slane %v951_v3, %v1155_v18 }
  0xa0   :  { %v318_v45 = vpop.permute.xlu1 %317  ;;  %v312_v50 = vpop.permute.xlu0 %311  ;;  %v415_v2 = vrot.slane %v269_v59, 4 }
  0xa1   :  { %v320_v53 = vsel %vm319_vm6, %v316_v5, %v318_v45  ;;  %v322_v55 = vsel %vm319_vm6, %v312_v50, %v314_v6  ;;  %v323_v61 = vsel %vm319_vm6, %v318_v45, %v312_v50  ;;  %v418_v45 = vrot.slane %v272_v60, 4  ;;  %1683 = vst [vmem:[#allocation4_spill] sm:$0xff] %v1377_v51 }
  0xa2   :  { %v347_v62 = vmul.f32 %v1316_v37, %v320_v53  ;;  %v345_v63 = vmul.f32 %v1329_v46, %v322_v55  ;;  %v348_v28 = vmul.f32 %v1332_v49, %v323_v61  ;;  %v445_v50 = vsel %vm435_vm4, %v232_v20, %v416_v54 }
  0xa3   :  { %v417_v53 = vrot.slane %v271_v0, 4 }
  0xa4   :  { %v278_v5 = vpop.permute.xlu1 %277  ;;  %v276_v6 = vpop.permute.xlu0 %275  ;;  %v429_v55 = vrot.slane %v347_v62, 4  ;;  %v427_v4 = vrot.slane %v345_v63, 4  ;;  %v430_v54 = vrot.slane %v348_v28, 4  ;;  %v444_v62 = vsel %vm435_vm4, %v231_v48, %v415_v2 }
  0xa5   :  { %v283_v10 = vsel %vm281_vm7, %v276_v6, %v278_v5  ;;  %v447_v63 = vsel %vm435_vm4, %v234_v47, %v418_v45  ;;  %v1399_v47 = vrot.slane %v951_v3, %v1159_v22  ;;  %v1402_v2 = vrot.slane %v951_v3, %v1145_v15 }
  0xa6   :  { %v308_v44 = vmul.f32 %v1345_v58, %v283_v10 }
  0xa7   :  { %1684 = vst [vmem:[#allocation5_spill] sm:$0xff] %v1399_v47  ;;  %1685 = vst [vmem:[#allocation6_spill] sm:$0xff] %v1402_v2 }
  0xa8   :  { %v280_v37 = vpop.permute.xlu1 %279  ;;  %v274_v38 = vpop.permute.xlu0 %273  ;;  %v449_v57 = vsel %vm435_vm4, %v308_v44, %v428_v1 }
  0xa9   :  { %v282_v61 = vsel %vm281_vm7, %v278_v5, %v280_v37  ;;  %v284_v10 = vsel %vm281_vm7, %v274_v38, %v276_v6  ;;  %v285_v59 = vsel %vm281_vm7, %v280_v37, %v274_v38  ;;  %v457_v20 = vpack.c.bf16 %v449_v57, %v445_v50 }
  0xaa   :  { %v309_v18 = vmul.f32 %v1364_v11, %v282_v61  ;;  %v307_v60 = vmul.f32 %v1367_v13, %v284_v10  ;;  %v310_v0 = vmul.f32 %v1370_v36, %v285_v59  ;;  %v446_v37 = vsel %vm435_vm4, %v233_v8, %v417_v53 }
  0xab   :  { %490 = vmatprep.subr.bf16.mxu0 %v457_v20 }
  0xac   :  { %v352_v5 = vpop.permute.xlu1 %351  ;;  %v350_v1 = vpop.permute.xlu0 %349  ;;  %v448_v6 = vsel %vm435_vm4, %v307_v60, %v427_v4  ;;  %v451_v44 = vsel %vm435_vm4, %v310_v0, %v430_v54  ;;  %v450_v28 = vsel %vm435_vm4, %v309_v18, %v429_v55  ;;  %v1405_v4 = vrot.slane %v951_v3, %v1157_v21  ;;  %v464_v0 = vld [vmem:[%s1666_s2] sm:$0xf] }
  0xad   :  { %v360_v50 = vsel %vm357_vm8, %v350_v1, %v352_v5  ;;  %v456_v38 = vpack.c.bf16 %v448_v6, %v444_v62  ;;  %v459_v57 = vpack.c.bf16 %v451_v44, %v447_v63  ;;  %v458_v61 = vpack.c.bf16 %v450_v28, %v446_v37 }
  0xae   :  { %v383_v48 = vmul.f32 %v1377_v51, %v360_v50  ;;  %1686 = vst [vmem:[#allocation7_spill] sm:$0xff] %v1405_v4  ;;  %v1687_v62 = vmov 0  }
  0xaf   :  { %491 = vmatpush1.bf16.msra.mxu0 %v456_v38  ;;  %531 = vmatprep.subr.bf16.mxu1 %v459_v57 }
  0xb0   :  { %v356_v8 = vpop.permute.xlu1 %355  ;;  %532 = vmatpush1.bf16.msra.mxu1 %v458_v61  ;;  %v354_v45 = vpop.permute.xlu0 %353  ;;  %v460_v10 = vpack.c.bf16 %v383_v48, %v383_v48 }
  0xb1   :  { %v361_v53 = vsel %vm357_vm8, %v356_v8, %v350_v1  ;;  %v358_v55 = vsel %vm357_vm8, %v354_v45, %v356_v8  ;;  %v359_v22 = vsel %vm357_vm8, %v352_v5, %v354_v45 }
  0xb2   :  { %v386_v15 = vmul.f32 %v1399_v47, %v361_v53  ;;  %v384_v21 = vmul.f32 %v1402_v2, %v359_v22  ;;  %v385_v3 = vmul.f32 %v1405_v4, %v358_v55  ;;  %v477_v18 = vsel %vm475_vm9, %v460_v10, 0 }
  0xb4   :  { %v463_v59 = vpack.c.bf16 %v386_v15, %v386_v15  ;;  %v461_v20 = vpack.c.bf16 %v384_v21, %v384_v21  ;;  %v462_v54 = vpack.c.bf16 %v385_v3, %v385_v3 }
  0xb6   :  { %952 = vmatprep.subr.msk.bf16.mxu0 %vm475_vm9, %v461_v20  ;;  %954 = vmatprep.subr.msk.bf16.mxu1 %vm475_vm9, %v463_v59  ;;  %v483_v60 = vsel %vm475_vm9, %v462_v54, 0 }
  0xb7   :  { %493 = vmatpush1.bf16.msra.mxu0 %v477_v18  ;;  %534 = vmatpush1.bf16.msra.mxu1 %v483_v60 }
  0xba   :  { %953 = vmatmul.mubr.msk.bf16.vlgmr.msra.gmra.mrb[0].mxu0 %vm471_vm10, %v464_v0  ;;  %955 = vmatmul.mubr.msk.bf16.vlgmr.msra.gmra.mrb[0].mxu1 %vm471_vm10, %v464_v0 }
  0xbb   :  { %801 = vmatprep.mubr.bf16.mxu0 %v1687_v62  ;;  %842 = vmatprep.mubr.bf16.mxu1 %v1687_v62 }
  0xc1   :  { %v469_v63 = vpop.permute.xlu0 %468 }
 0x18d   :  { %v563_v5 = vpop.f32.mrb[0].mxu1  ;;  %v522_v1 = vpop.f32.mrb[0].mxu0 }
 0x18e   :  { %v564_v6 = vadd.f32 %v563_v5, %v469_v63  ;;  %v523_v44 = vadd.f32 %v522_v1, %v469_v63  ;;  %v524_v37 = vpop.f32.mrb[1].mxu0  ;;  %v565_v28 = vpop.f32.mrb[1].mxu1 }
 0x18f   :  { %v526_v50 = vpop.f32.mrb[2].mxu0  ;;  %v567_v38 = vpop.f32.mrb[2].mxu1  ;;  %v525_v15 = vadd.f32 %v524_v37, %v469_v63  ;;  %v566_v20 = vadd.f32 %v565_v28, %v469_v63  ;;  %v747_v37 = vld [vmem:[%s1667_s5] sm:$0xf] }
 0x190   :  { %v576_v57 = vmin.f32 %v564_v6, 0.0  ;;  %v574_v61 = vmin.f32 %v523_v44, 0.0  ;;  %v527_v48 = vpop.f32.mrb[3].mxu0  ;;  %v568_v8 = vpop.f32.mrb[3].mxu1  ;;  %vm570_vm11 = vcmp.gt.f32.partialorder %v523_v44, 0.0  ;;  %vm572_vm12 = vcmp.gt.f32.partialorder %v564_v6, 0.0 }
 0x191   :  { %v575_v59 = vmin.f32 %v525_v15, 0.0  ;;  %v577_v60 = vmin.f32 %v566_v20, 0.0  ;;  %vm571_vm13 = vcmp.gt.f32.partialorder %v525_v15, 0.0  ;;  %vm573_vm14 = vcmp.gt.f32.partialorder %v566_v20, 0.0 }
 0x192   :  { %v582_v45 = vmul.f32 1.442695, %v576_v57  ;;  %v578_v53 = vmul.f32 1.442695, %v574_v61 }
 0x193   :  { %v580_v18 = vmul.f32 1.442695, %v575_v59  ;;  %v584_v0 = vmul.f32 1.442695, %v577_v60 }
 0x194   :  { %982 = vpow2.f32 %v582_v45 }
 0x195   :  { %984 = vpow2.f32 %v578_v53 }
 0x196   :  { %986 = vpow2.f32 %v580_v18 }
 0x197   :  { %988 = vpow2.f32 %v584_v0 }
 0x19e   :  { %v983_v55 = vpop.eup %982 }
 0x19f   :  { %v985_v22 = vpop.eup %984  ;;  %v958_v21 = vadd.f32 -1.0, %v983_v55 }
 0x1a0   :  { %v956_v10 = vadd.f32 -1.0, %v985_v22  ;;  %v987_v62 = vpop.eup %986 }
 0x1a1   :  { %v1427_v54 = vsel %vm572_vm12, %v564_v6, %v958_v21  ;;  %v957_v63 = vadd.f32 -1.0, %v987_v62  ;;  %v989_v5 = vpop.eup %988 }
 0x1a2   :  { %v1421_v3 = vsel %vm570_vm11, %v523_v44, %v956_v10  ;;  %v959_v6 = vadd.f32 -1.0, %v989_v5 }
 0x1a3   :  { %610 = vrot.lane.b32.xlu0 %v1421_v3, %s1001_s30  ;;  %594 = vrot.lane.b32.xlu1 %v1421_v3, %s1002_s0  ;;  %v1453_v1 = vsel %vm571_vm13, %v525_v15, %v957_v63 }
 0x1a4   :  { %v1459_v44 = vsel %vm573_vm14, %v566_v20, %v959_v6 }
 0x1a7   :  { %598 = vrot.lane.b32.xlu0 %v1427_v54, %s1002_s0  ;;  %614 = vrot.lane.b32.xlu1 %v1427_v54, %s1001_s30 }
 0x1ab   :  { %626 = vrot.lane.b32.xlu0 %v1421_v3, %s1003_s11  ;;  %646 = vrot.lane.b32.xlu1 %v1427_v54, %s1000_s29 }
 0x1af   :  { %642 = vrot.lane.b32.xlu0 %v1421_v3, %s1000_s29  ;;  %666 = vrot.lane.b32.xlu1 %v1427_v54, %s1004_s12 }
 0x1b3   :  { %630 = vrot.lane.b32.xlu0 %v1427_v54, %s1003_s11  ;;  %682 = vrot.lane.b32.xlu1 %v1427_v54, %s1006_s14 }
 0x1b7   :  { %662 = vrot.lane.b32.xlu0 %v1421_v3, %s1004_s12  ;;  %698 = vrot.lane.b32.xlu1 %v1427_v54, %s1005_s13 }
 0x1bb   :  { %678 = vrot.lane.b32.xlu0 %v1421_v3, %s1006_s14  ;;  %694 = vrot.lane.b32.xlu1 %v1421_v3, %s1005_s13 }
 0x1bf   :  { %710 = vrot.lane.b32.xlu0 %v1421_v3, %s1008_s15  ;;  %596 = vrot.lane.b32.xlu1 %v1453_v1, %s1002_s0 }
 0x1c3   :  { %600 = vrot.lane.b32.xlu0 %v1459_v44, %s1002_s0  ;;  %612 = vrot.lane.b32.xlu1 %v1453_v1, %s1001_s30 }
 0x1c7   :  { %632 = vrot.lane.b32.xlu0 %v1459_v44, %s1003_s11  ;;  %616 = vrot.lane.b32.xlu1 %v1459_v44, %s1001_s30 }
 0x1cb   :  { %664 = vrot.lane.b32.xlu0 %v1453_v1, %s1004_s12  ;;  %628 = vrot.lane.b32.xlu1 %v1453_v1, %s1003_s11 }
 0x1cf   :  { %680 = vrot.lane.b32.xlu0 %v1453_v1, %s1006_s14  ;;  %644 = vrot.lane.b32.xlu1 %v1453_v1, %s1000_s29 }
 0x1d3   :  { %696 = vrot.lane.b32.xlu0 %v1453_v1, %s1005_s13  ;;  %648 = vrot.lane.b32.xlu1 %v1459_v44, %s1000_s29 }
 0x1d7   :  { %684 = vrot.lane.b32.xlu0 %v1459_v44, %s1006_s14  ;;  %668 = vrot.lane.b32.xlu1 %v1459_v44, %s1004_s12 }
 0x1db   :  { %714 = vrot.lane.b32.xlu0 %v1427_v54, %s1008_s15  ;;  %700 = vrot.lane.b32.xlu1 %v1459_v44, %s1005_s13 }
 0x1df   :  { %750 = vperm.xlu0 %978, %v747_v37   ;;  %712 = vrot.lane.b32.xlu1 %v1453_v1, %s1008_s15 }
 0x1e3   :  { %716 = vrot.lane.b32.xlu1 %v1459_v44, %s1008_s15 }
 0x215   :  { %v611_v28 = vpop.permute.xlu0 %610  ;;  %v595_v50 = vpop.permute.xlu1 %594 }
 0x219   :  { %v599_v38 = vpop.permute.xlu0 %598  ;;  %v615_v57 = vpop.permute.xlu1 %614 }
 0x21d   :  { %v627_v61 = vpop.permute.xlu0 %626  ;;  %v1496_v48 = vpop.permute.xlu1 %646 }
 0x221   :  { %v1498_v8 = vpop.permute.xlu0 %642  ;;  %v1500_v45 = vpop.permute.xlu1 %666 }
 0x225   :  { %v631_v53 = vpop.permute.xlu0 %630  ;;  %v1502_v55 = vpop.permute.xlu1 %682 }
 0x229   :  { %v1504_v22 = vpop.permute.xlu0 %662  ;;  %v1506_v10 = vpop.permute.xlu1 %698 }
 0x22d   :  { %v1508_v15 = vpop.permute.xlu0 %678  ;;  %v1510_v21 = vpop.permute.xlu1 %694 }
 0x231   :  { %v1512_v59 = vpop.permute.xlu0 %710  ;;  %v597_v20 = vpop.permute.xlu1 %596 }
 0x232   :  { %1688 = vst [vmem:[#allocation8_spill] sm:$0xff] %v1512_v59  ;;  %v604_v18 = vsel %vm66_vm2, %v595_v50, %v597_v20  ;;  %v603_v59 = vsel %vm66_vm2, %v597_v20, %v599_v38 }
 0x233   :  { %v607_v63 = vmul.f32 %v604_v18, %v1182_v31 }
 0x235   :  { %v601_v60 = vpop.permute.xlu0 %600  ;;  %v613_v0 = vpop.permute.xlu1 %612 }
 0x236   :  { %v620_v62 = vsel %vm104_vm1, %v611_v28, %v613_v0  ;;  %v605_v5 = vsel %vm66_vm2, %v601_v60, %v595_v50  ;;  %v602_v37 = vsel %vm66_vm2, %v599_v38, %v601_v60  ;;  %v619_v47 = vsel %vm104_vm1, %v613_v0, %v615_v57 }
 0x237   :  { %v623_v6 = vmul.f32 %v620_v62, %v1168_v25  ;;  %v606_v49 = vmul.f32 %v605_v5, %v1208_v42  ;;  %v609_v50 = vmul.f32 %v602_v37, %v1228_v56  ;;  %v624_v18 = vmul.f32 %v619_v47, %v1185_v33 }
 0x238   :  { %v608_v62 = vmul.f32 %v603_v59, %v1224_v52 }
 0x239   :  { %v633_v4 = vpop.permute.xlu0 %632  ;;  %v617_v2 = vpop.permute.xlu1 %616  ;;  %v727_v51 = vpack.c.bf16 %v623_v6, %v607_v63  ;;  %v660_v6 = vmul.f32 %v1427_v54, %v1322_v43 }
 0x23a   :  { %v618_v31 = vsel %vm104_vm1, %v615_v57, %v617_v2  ;;  %v621_v25 = vsel %vm104_vm1, %v617_v2, %v611_v28  ;;  %v728_v5 = vpack.c.bf16 %v624_v18, %v608_v62  ;;  %v634_v56 = vsel %vm142_vm3, %v631_v53, %v633_v4 }
 0x23b   :  { %v622_v60 = vmul.f32 %v621_v25, %v1179_v29  ;;  %v625_v0 = vmul.f32 %v618_v31, %v1188_v34  ;;  %769 = vmatprep.subr.bf16.mxu0 %v727_v51  ;;  %v658_v28 = vmul.f32 %v1421_v3, %v1298_v23  ;;  %v641_v3 = vmul.f32 %v634_v56, %v1253_v17 }
 0x23c   :  { %v661_v25 = vmul.f32 %v1459_v44, %v1310_v32 }
 0x23d   :  { %v726_v38 = vpack.c.bf16 %v622_v60, %v606_v49  ;;  %v665_v20 = vpop.permute.xlu0 %664  ;;  %v629_v42 = vpop.permute.xlu1 %628  ;;  %v729_v63 = vpack.c.bf16 %v625_v0, %v609_v50  ;;  %v637_v49 = vsel %vm142_vm3, %v633_v4, %v627_v61 }
 0x23e   :  { %v636_v2 = vsel %vm142_vm3, %v627_v61, %v629_v42  ;;  %v671_v33 = vsel %vm243_vm5, %v665_v20, %v1500_v45  ;;  %v672_v4 = vsel %vm243_vm5, %v1504_v22, %v665_v20  ;;  %v638_v23 = vmul.f32 %v637_v49, %v1247_v14 }
 0x23f   :  { %770 = vmatpush1.bf16.msra.mxu0 %v726_v38  ;;  %810 = vmatprep.subr.bf16.mxu1 %v729_v63  ;;  %v639_v51 = vmul.f32 %v636_v2, %v1199_v39  ;;  %v675_v57 = vmul.f32 %v671_v33, %v1287_v9  ;;  %v635_v39 = vsel %vm142_vm3, %v629_v42, %v631_v53 }
 0x240   :  { %811 = vmatpush1.bf16.msra.mxu1 %v728_v5  ;;  %v659_v9 = vmul.f32 %v1453_v1, %v1281_v7  ;;  %v674_v17 = vmul.f32 %v672_v4, %v1304_v27  ;;  %v640_v1 = vmul.f32 %v635_v39, %v1250_v16 }
 0x241   :  { %v681_v29 = vpop.permute.xlu0 %680  ;;  %v645_v34 = vpop.permute.xlu1 %644 }
 0x242   :  { %v652_v52 = vsel %vm180_vm0, %v1498_v8, %v645_v34  ;;  %v651_v59 = vsel %vm180_vm0, %v645_v34, %v1496_v48  ;;  %v734_v20 = vpack.c.bf16 %v674_v17, %v658_v28  ;;  %v1693_v28 = vld [vmem:[#allocation6_spill] sm:$0xff] }
 0x243   :  { %v655_v47 = vmul.f32 %v652_v52, %v1165_v24  ;;  %v656_v53 = vmul.f32 %v651_v59, %v1202_v40  ;;  %v687_v40 = vsel %vm281_vm7, %v681_v29, %v1502_v55 }
 0x245   :  { %v697_v24 = vpop.permute.xlu0 %696  ;;  %v649_v61 = vpop.permute.xlu1 %648  ;;  %v731_v37 = vpack.c.bf16 %v655_v47, %v639_v51  ;;  %v732_v60 = vpack.c.bf16 %v656_v53, %v640_v1  ;;  %v1692_v51 = vld [vmem:[#allocation4_spill] sm:$0xff] }
 0x246   :  { %v650_v43 = vsel %vm180_vm0, %v1496_v48, %v649_v61  ;;  %v653_v54 = vsel %vm180_vm0, %v649_v61, %v1498_v8  ;;  %v703_v31 = vsel %vm319_vm6, %v697_v24, %v1506_v10  ;;  %v735_v48 = vpack.c.bf16 %v675_v57, %v659_v9  ;;  %v1694_v61 = vld [vmem:[#allocation7_spill] sm:$0xff]  ;;  %v1695_v9 = vld [vmem:[#allocation5_spill] sm:$0xff] }
 0x247   :  { %v654_v7 = vmul.f32 %v653_v54, %v1191_v35  ;;  %v657_v14 = vmul.f32 %v650_v43, %v1205_v41  ;;  %771 = vmatprep.subr.bf16.mxu0 %v731_v37  ;;  %v688_v8 = vsel %vm281_vm7, %v1508_v15, %v681_v29  ;;  %v704_v16 = vsel %vm319_vm6, %v1510_v21, %v697_v24  ;;  %v746_v43 = vld [vmem:[%s1668_s4] sm:$0x3] }
 0x248   :  { %v707_v27 = vmul.f32 %v703_v31, %v1293_v19  ;;  %v691_v19 = vmul.f32 %v687_v40, %v1345_v58  ;;  %v706_v42 = vmul.f32 %v704_v16, %v1329_v46  ;;  %v1690_v46 = vld [vmem:[#allocation3_spill] sm:$0xff] }
 0x249   :  { %v730_v35 = vpack.c.bf16 %v654_v7, %v638_v23  ;;  %v685_v50 = vpop.permute.xlu0 %684  ;;  %v669_v41 = vpop.permute.xlu1 %668  ;;  %v733_v18 = vpack.c.bf16 %v657_v14, %v641_v3 }
 0x24a   :  { %v670_v32 = vsel %vm243_vm5, %v1500_v45, %v669_v41  ;;  %v673_v44 = vsel %vm243_vm5, %v669_v41, %v1504_v22  ;;  %v686_v0 = vsel %vm281_vm7, %v1502_v55, %v685_v50  ;;  %v689_v45 = vsel %vm281_vm7, %v685_v50, %v1508_v15 }
 0x24b   :  { %v676_v62 = vmul.f32 %v670_v32, %v1301_v26  ;;  %v677_v38 = vmul.f32 %v673_v44, %v1307_v30  ;;  %772 = vmatpush1.bf16.msra.mxu0 %v730_v35  ;;  %812 = vmatprep.subr.bf16.mxu1 %v733_v18  ;;  %v690_v22 = vmul.f32 %v688_v8, %v1367_v13  ;;  %v1689_v13 = vld [vmem:[#allocation2_spill] sm:$0xff] }
 0x24c   :  { %773 = vmatprep.subr.bf16.mxu0 %v735_v48  ;;  %813 = vmatpush1.bf16.msra.mxu1 %v732_v60  ;;  %v692_v30 = vmul.f32 %v686_v0, %v1364_v11  ;;  %v739_v5 = vpack.c.bf16 %v707_v27, %v691_v19  ;;  %v693_v2 = vmul.f32 %v689_v45, %v1370_v36 }
 0x24d   :  { %v736_v63 = vpack.c.bf16 %v676_v62, %v660_v6  ;;  %v701_v55 = vpop.permute.xlu1 %700  ;;  %v737_v26 = vpack.c.bf16 %v677_v38, %v661_v25  ;;  %v738_v34 = vpack.c.bf16 %v706_v42, %v690_v22  ;;  %v715_v11 = vpop.permute.xlu0 %714 }
 0x24e   :  { %v702_v58 = vsel %vm319_vm6, %v1506_v10, %v701_v55  ;;  %v705_v15 = vsel %vm319_vm6, %v701_v55, %v1510_v21  ;;  %v1691_v21 = vld [vmem:[#allocation8_spill] sm:$0xff] }
 0x24f   :  { %v708_v33 = vmul.f32 %v702_v58, %v1689_v13  ;;  %v709_v29 = vmul.f32 %v705_v15, %v1690_v46  ;;  %774 = vmatpush1.bf16.msra.mxu0 %v734_v20  ;;  %814 = vmatprep.subr.bf16.mxu1 %v737_v26 }
 0x250   :  { %775 = vmatprep.subr.bf16.mxu0 %v739_v5  ;;  %815 = vmatpush1.bf16.msra.mxu1 %v736_v63 }
 0x251   :  { %v740_v52 = vpack.c.bf16 %v708_v33, %v692_v30  ;;  %v713_v56 = vpop.permute.xlu1 %712  ;;  %v741_v10 = vpack.c.bf16 %v709_v29, %v693_v2 }
 0x252   :  { %v719_v49 = vsel %vm357_vm8, %v713_v56, %v715_v11  ;;  %v720_v36 = vsel %vm357_vm8, %v1691_v21, %v713_v56 }
 0x253   :  { %v722_v47 = vmul.f32 %v720_v36, %v1692_v51  ;;  %v723_v57 = vmul.f32 %v719_v49, %v1693_v28  ;;  %776 = vmatpush1.bf16.msra.mxu0 %v738_v34  ;;  %816 = vmatprep.subr.bf16.mxu1 %v741_v10 }
 0x254   :  { %817 = vmatpush1.bf16.msra.mxu1 %v740_v52 }
 0x255   :  { %v742_v59 = vpack.c.bf16 %v722_v47, %v722_v47  ;;  %v743_v6 = vpack.c.bf16 %v723_v57, %v723_v57  ;;  %v717_v4 = vpop.permute.xlu1 %716 }
 0x256   :  { %v718_v39 = vsel %vm357_vm8, %v715_v11, %v717_v4  ;;  %v721_v24 = vsel %vm357_vm8, %v717_v4, %v1691_v21 }
 0x257   :  { %v724_v37 = vmul.f32 %v718_v39, %v1694_v61  ;;  %v725_v23 = vmul.f32 %v721_v24, %v1695_v9  ;;  %960 = vmatprep.subr.msk.bf16.mxu0 %vm435_vm4, %v743_v6  ;;  %v758_v3 = vsel %vm435_vm4, %v742_v59, 0 }
 0x258   :  { %778 = vmatpush1.bf16.msra.mxu0 %v758_v3 }
 0x259   :  { %v744_v54 = vpack.c.bf16 %v724_v37, %v724_v37  ;;  %v745_v53 = vpack.c.bf16 %v725_v23, %v725_v23 }
 0x25b   :  { %961 = vmatmul.mubr.msk.bf16.vlgmr.msra.gmra.mrb[4].mxu0 %vm753_vm15, %v746_v43  ;;  %962 = vmatprep.subr.msk.bf16.mxu1 %vm435_vm4, %v745_v53  ;;  %v764_v12 = vsel %vm435_vm4, %v744_v54, 0 }
 0x25c   :  { %819 = vmatpush1.bf16.msra.mxu1 %v764_v12  ;;  %v907_v12 = vld [vmem:[%s1670_s7] sm:$0xf] }
 0x25e   :  { %v751_v31 = vpop.permute.xlu0 %750 }
 0x25f   :  { %963 = vmatmul.mubr.msk.bf16.vlgmr.msra.gmra.mrb[4].mxu1 %vm753_vm15, %v746_v43  ;;  %v903_v43 = vld [vmem:[%s1669_s6] sm:$0xf] }
 0x32e   :  { %v803_v7 = vpop.f32.mrb[4].mxu0 }
 0x32f   :  { %v804_v14 = vadd.f32 %v803_v7, %v751_v31  ;;  %v805_v17 = vpop.f32.mrb[5].mxu0 }
 0x330   :  { %v806_v1 = vadd.f32 %v805_v17, %v751_v31  ;;  %v807_v48 = vpop.f32.mrb[6].mxu0 }
 0x331   :  { %v855_v25 = vmin.f32 %v804_v14, 0.0  ;;  %v808_v40 = vpop.f32.mrb[7].mxu0  ;;  %vm851_vm0 = vcmp.gt.f32.partialorder %v804_v14, 0.0 }
 0x332   :  { %v856_v8 = vmin.f32 %v806_v1, 0.0  ;;  %v844_v35 = vpop.f32.mrb[4].mxu1  ;;  %vm852_vm1 = vcmp.gt.f32.partialorder %v806_v1, 0.0 }
 0x333   :  { %v859_v50 = vmul.f32 1.442695, %v855_v25  ;;  %v845_v41 = vadd.f32 %v844_v35, %v751_v31  ;;  %v846_v18 = vpop.f32.mrb[5].mxu1 }
 0x334   :  { %v861_v16 = vmul.f32 1.442695, %v856_v8  ;;  %v847_v27 = vadd.f32 %v846_v18, %v751_v31  ;;  %v848_v32 = vpop.f32.mrb[6].mxu1 }
 0x335   :  { %990 = vpow2.f32 %v859_v50  ;;  %v857_v44 = vmin.f32 %v845_v41, 0.0  ;;  %v849_v60 = vpop.f32.mrb[7].mxu1  ;;  %vm853_vm2 = vcmp.gt.f32.partialorder %v845_v41, 0.0 }
 0x336   :  { %992 = vpow2.f32 %v861_v16  ;;  %v858_v0 = vmin.f32 %v847_v27, 0.0  ;;  %vm854_vm3 = vcmp.gt.f32.partialorder %v847_v27, 0.0 }
 0x337   :  { %v863_v62 = vmul.f32 1.442695, %v857_v44 }
 0x338   :  { %v865_v38 = vmul.f32 1.442695, %v858_v0 }
 0x339   :  { %994 = vpow2.f32 %v863_v62 }
 0x33a   :  { %996 = vpow2.f32 %v865_v38 }
 0x33f   :  { %v991_v20 = vpop.eup %990 }
 0x340   :  { %v993_v19 = vpop.eup %992  ;;  %v964_v45 = vadd.f32 -1.0, %v991_v20 }
 0x341   :  { %v965_v22 = vadd.f32 -1.0, %v993_v19 }
 0x342   :  { %v871_v42 = vsel %vm851_vm0, %v804_v14, %v964_v45 }
 0x343   :  { %v995_v63 = vpop.eup %994  ;;  %v872_v55 = vsel %vm852_vm1, %v806_v1, %v965_v22  ;;  %v875_v26 = vsel %vm435_vm4, %v871_v42, 0.0 }
 0x344   :  { %v997_v30 = vpop.eup %996  ;;  %v966_v58 = vadd.f32 -1.0, %v995_v63  ;;  %v876_v15 = vsel %vm435_vm4, %v872_v55, 0.0 }
 0x345   :  { %v967_v5 = vadd.f32 -1.0, %v997_v30  ;;  %v877_v2 = vadd.f32 %v876_v15, %v875_v26 }
 0x346   :  { %v873_v13 = vsel %vm853_vm2, %v845_v41, %v966_v58 }
 0x347   :  { %v874_v33 = vsel %vm854_vm3, %v847_v27, %v967_v5  ;;  %v878_v46 = vsel %vm435_vm4, %v873_v13, 0.0 }
 0x348   :  { %v879_v29 = vadd.f32 %v878_v46, %v877_v2  ;;  %v880_v34 = vsel %vm435_vm4, %v874_v33, 0.0 }
 0x34a   :  { %v881_v11 = vadd.f32 %v880_v34, %v879_v29 }
 0x34c   :  { %882 = vadd.xlane.f32.xlu1 %v881_v11 }
 0x3d9   :  { %v883_v52 = vpop.xlane.xlu1 %882 }
 0x3da   :  { %v884_v56 = vmul.f32 0.001953125, %v883_v52 }
 0x3dc   :  { %v885_v10 = vsub.f32 %v871_v42, %v884_v56  ;;  %v886_v49 = vsub.f32 %v872_v55, %v884_v56  ;;  %v887_v21 = vsub.f32 %v873_v13, %v884_v56  ;;  %v888_v36 = vsub.f32 %v874_v33, %v884_v56 }
 0x3de   :  { %v889_v51 = vmul.f32 %v885_v10, %v885_v10  ;;  %v890_v47 = vmul.f32 %v886_v49, %v886_v49  ;;  %v891_v28 = vmul.f32 %v887_v21, %v887_v21  ;;  %v892_v57 = vmul.f32 %v888_v36, %v888_v36 }
 0x3e0   :  { %v893_v59 = vsel %vm435_vm4, %v889_v51, 0.0  ;;  %v894_v6 = vsel %vm435_vm4, %v890_v47, 0.0  ;;  %v896_v39 = vsel %vm435_vm4, %v891_v28, 0.0  ;;  %v898_v61 = vsel %vm435_vm4, %v892_v57, 0.0 }
 0x3e1   :  { %v895_v4 = vadd.f32 %v894_v6, %v893_v59 }
 0x3e3   :  { %v897_v24 = vadd.f32 %v896_v39, %v895_v4 }
 0x3e5   :  { %v899_v37 = vadd.f32 %v898_v61, %v897_v24 }
 0x3e7   :  { %900 = vadd.xlane.f32.xlu0 %v899_v37 }
 0x474   :  { %v901_v9 = vpop.xlane.xlu0 %900 }
 0x475   :  { %v902_v23 = vmul.f32 0.001953125, %v901_v9 }
 0x477   :  { %v904_v3 = vadd.f32 1e-05, %v902_v23 }
 0x479   :  { %998 = vrsqrt.f32 %v904_v3 }
 0x483   :  { %v999_v54 = vpop.eup %998 }
 0x484   :  { %v906_v53 = vmul.f32 %v999_v54, %v903_v43 }
 0x486   :  { %912 = vperm.xlu0 %978, %v906_v53   ;;  %v908_v31 = vmul.f32 %v906_v53, %v884_v56 }
 0x488   :  { %v909_v7 = vsub.f32 %v907_v12, %v908_v31 }
 0x48a   :  { %921 = vperm.xlu1 %979, %v909_v7  }
 0x505   :  { %v913_v14 = vpop.permute.xlu0 %912 }
 0x506   :  { %v915_v17 = vmul.f32 %v913_v14, %v871_v42  ;;  %v916_v1 = vmul.f32 %v913_v14, %v872_v55  ;;  %v917_v48 = vmul.f32 %v913_v14, %v873_v13  ;;  %v918_v25 = vmul.f32 %v913_v14, %v874_v33 }
 0x509   :  { %v922_v40 = vpop.permute.xlu1 %921 }
 0x50a   :  { %v924_v8 = vadd.f32 %v922_v40, %v915_v17  ;;  %v925_v35 = vadd.f32 %v922_v40, %v916_v1  ;;  %v926_v50 = vadd.f32 %v922_v40, %v917_v48  ;;  %v927_v41 = vadd.f32 %v922_v40, %v918_v25 }
 0x50c   :  { %v930_v18 = vcombine.low %v924_v8, %v925_v35  ;;  %v935_v16 = vcombine.low %v926_v50, %v927_v41 }
 0x50e   :  { %932 = vst [vmem:[%s1671_s8] sm:$0xff] %v930_v18  ;;  %968 = vst [vmem:[%s1671_s8 + $0x8] sm:$0xff] %v935_v16 }

</bundles_post_ra>
